<compile_context>
chip_gen: v7x
topology: tpu7x:2x2x1
jax: 0.10.0
libtpu: 0.0.40
codegen_flags: <defaults>
</compile_context>

<pallas_src>
import numpy as np
import jax
import jax.numpy as jnp
from jax.experimental import pallas as pl
from jax.experimental.pallas import tpu as pltpu


def _make_mlp_block_kernel(has_emb: bool):
    """Build the fused kernel; `has_emb` selects the 10-ref / 11-ref variant."""

    def kernel(*refs):
        if has_emb:
            (x_ref, emb_ref, a1_ref, be1_ref, wc_ref, bc_ref,
             a2_ref, be2_ref, wl_ref, bl_ref, o_ref) = refs
        else:
            (x_ref, a1_ref, be1_ref, wc_ref, bc_ref,
             a2_ref, be2_ref, wl_ref, bl_ref, o_ref) = refs

        eps = jnp.float32(1e-5)

        x = x_ref[...]                                   # [B_BLK, S, D] f32
        if has_emb:
            x = x + emb_ref[...]
        b_blk, S, D = x.shape

        # ---- block1: LN_spatial -> Conv1d(S, S, 1) (token mix) -> SiLU -> residual
        mean = jnp.mean(x, axis=-1, keepdims=True)
        var = jnp.mean((x - mean) ** 2, axis=-1, keepdims=True)
        y = (x - mean) * jax.lax.rsqrt(var + eps)        # rsqrt -> EUP slot
        y = y * a1_ref[...] + be1_ref[...]               # [1, D] affine broadcast

        wcb = jnp.broadcast_to(wc_ref[...], (b_blk, S, S))
        h = jnp.einsum("bos,bsd->bod", wcb, y,
                       preferred_element_type=jnp.float32)
        h = h + bc_ref[...]                              # lane-dense [S, D] bias
        h = h * jax.nn.sigmoid(h)                        # SiLU
        x = x + h

        # ---- block2: LN_spatial -> Linear(D, D) (channel mix) -> SiLU -> residual
        mean = jnp.mean(x, axis=-1, keepdims=True)
        var = jnp.mean((x - mean) ** 2, axis=-1, keepdims=True)
        y = (x - mean) * jax.lax.rsqrt(var + eps)
        y = y * a2_ref[...] + be2_ref[...]

        # Dominant GEMM on the collapsed [B_BLK*S, D] view (fills the MXU rows).
        y2 = y.reshape(b_blk * S, D)
        h2 = jnp.dot(y2, wl_ref[...],
                     preferred_element_type=jnp.float32) + bl_ref[...]
        h2 = h2 * jax.nn.sigmoid(h2)

        o_ref[...] = (x + h2.reshape(b_blk, S, D)).astype(o_ref.dtype)

    return kernel


def _pick_b_blk(B: int, max_rows: int = 256) -> int:
    """Largest divisor of B <= max_rows; keep grid >= 2 when B >= 2 (v7x 2 TCs)."""
    cap = max_rows
    if B >= 2:
        cap = min(cap, B // 2)
    cap = max(min(cap, B), 1)
    for cand in range(cap, 0, -1):
        if B % cand == 0:
            return cand
    return 1


def mlp_block_forward(x, a1, be1, wc, bc, a2, be2, wl_t, bl, emb=None,
                      max_rows_per_step: int = 256):
    """Fused MLPblock forward.

    x, emb: [B, S, D] f32.  wc: [S, S] Conv1d(S,S,1) weight (kernel dim squeezed),
    bc: [S] or [S, 1] conv bias.  wl_t: [D_in, D_out] Linear weight pre-transposed,
    bl: [D] or [1, D].  a*/be*: LN_spatial affine params, any shape reshapable to [D].
    Returns [B, S, D].
    """
    B, S, D = x.shape
    has_emb = emb is not None
    b_blk = _pick_b_blk(B, max_rows_per_step)
    grid = (B // b_blk,)

    # Canonical parameter layouts (lane-dense; conv bias pre-broadcast to [S, D]).
    a1 = jnp.asarray(a1, x.dtype).reshape(1, D)
    be1 = jnp.asarray(be1, x.dtype).reshape(1, D)
    a2 = jnp.asarray(a2, x.dtype).reshape(1, D)
    be2 = jnp.asarray(be2, x.dtype).reshape(1, D)
    wc = jnp.asarray(wc, x.dtype).reshape(S, S)
    bc_bcast = jnp.broadcast_to(jnp.asarray(bc, x.dtype).reshape(S, 1), (S, D))
    wl_t = jnp.asarray(wl_t, x.dtype).reshape(D, D)
    bl = jnp.asarray(bl, x.dtype).reshape(1, D)

    row = pl.BlockSpec((b_blk, S, D), lambda b: (b, 0, 0))
    const = lambda shp: pl.BlockSpec(shp, lambda b: tuple(0 for _ in shp))

    n_slabs = 3 if has_emb else 2
    itemsize = np.dtype(x.dtype).itemsize
    cost = pl.CostEstimate(
        flops=2 * B * S * S * D + 2 * B * S * D * D + 12 * B * S * D,
        transcendentals=2 * B * S * D + 2 * B * S,
        bytes_accessed=itemsize * (n_slabs * B * S * D
                                   + S * S + S * D + D * D + 5 * D),
    )

    in_specs = [row]
    args = [x]
    if has_emb:
        in_specs.append(row)
        args.append(emb)
    in_specs += [
        const((1, D)), const((1, D)),   # LN1 alpha, beta
        const((S, S)), const((S, D)),   # Conv1d weight, bias (pre-broadcast)
        const((1, D)), const((1, D)),   # LN2 alpha, beta
        const((D, D)), const((1, D)),   # Linear weight^T, bias
    ]
    args += [a1, be1, wc, bc_bcast, a2, be2, wl_t, bl]

    return pl.pallas_call(
        _make_mlp_block_kernel(has_emb),
        out_shape=jax.ShapeDtypeStruct((B, S, D), x.dtype),
        grid=grid,
        in_specs=in_specs,
        out_specs=row,
        compiler_params=pltpu.CompilerParams(
            dimension_semantics=("parallel",),      # 2-TC sharding on v7x
            vmem_limit_bytes=64 * 1024 * 1024,      # big slabs OK on v5e/v6e/v7x
        ),
        cost_estimate=cost,
    )(*args)


def mlp_block_ref(x, a1, be1, wc, bc, a2, be2, wl_t, bl, emb=None, eps=1e-5):
    """Pure-JAX reference mirroring the PyTorch module."""
    hp = jax.lax.Precision.HIGHEST
    B, S, D = x.shape
    if emb is not None:
        x = x + emb
    a1 = a1.reshape(1, 1, D); be1 = be1.reshape(1, 1, D)
    a2 = a2.reshape(1, 1, D); be2 = be2.reshape(1, 1, D)
    # block1
    mean = x.mean(-1, keepdims=True)
    var = ((x - mean) ** 2).mean(-1, keepdims=True)
    y = (x - mean) / jnp.sqrt(var + eps)
    y = y * a1 + be1
    h = jnp.einsum("os,bsd->bod", wc.reshape(S, S), y, precision=hp)
    h = h + bc.reshape(1, S, 1)
    h = h * jax.nn.sigmoid(h)
    x = x + h
    # block2
    mean = x.mean(-1, keepdims=True)
    var = ((x - mean) ** 2).mean(-1, keepdims=True)
    y = (x - mean) / jnp.sqrt(var + eps)
    y = y * a2 + be2
    h = jnp.einsum("bsd,de->bse", y, wl_t.reshape(D, D), precision=hp)
    h = h + bl.reshape(1, 1, D)
    h = h * jax.nn.sigmoid(h)
    return x + h


if __name__ == "__main__":
    # Small TPU-friendly shapes: D = 128 lanes (dense stores), S = 16 (8-sublane
    # multiple), B = 2 -> B_BLK = 1, grid = (2,) so the parallel axis is >= 2.
    B, S, D = 2, 16, 128

    key = jax.random.PRNGKey(0)
    k = jax.random.split(key, 10)

    x = jax.random.normal(k[0], (B, S, D), jnp.float32)
    emb = jax.random.normal(k[1], (B, S, D), jnp.float32)

    # LN_spatial affine params (PyTorch shape [1,1,D]).
    a1 = 1.0 + 0.1 * jax.random.normal(k[2], (1, 1, D), jnp.float32)
    be1 = 0.1 * jax.random.normal(k[3], (1, 1, D), jnp.float32)
    a2 = 1.0 + 0.1 * jax.random.normal(k[4], (1, 1, D), jnp.float32)
    be2 = 0.1 * jax.random.normal(k[5], (1, 1, D), jnp.float32)

    # Conv1d(S, S, 1): weight [S_out, S_in] (kernel dim squeezed), bias [S].
    cb = 1.0 / np.sqrt(S)
    wc = jax.random.uniform(k[6], (S, S), jnp.float32, -cb, cb)
    bc = jax.random.uniform(k[7], (S,), jnp.float32, -cb, cb)

    # Linear(D, D): stored pre-transposed as [D_in, D_out], bias [D].
    lb = 1.0 / np.sqrt(D)
    wl_t = jax.random.uniform(k[8], (D, D), jnp.float32, -lb, lb)
    bl = jax.random.uniform(k[9], (D,), jnp.float32, -lb, lb)

    # --- with emb ---
    out = mlp_block_forward(x, a1, be1, wc, bc, a2, be2, wl_t, bl, emb=emb)
    out = jax.block_until_ready(out)
    ref = mlp_block_ref(x, a1, be1, wc, bc, a2, be2, wl_t, bl, emb=emb)
    np.testing.assert_allclose(np.asarray(out), np.asarray(ref), rtol=1e-4, atol=1e-4)
    assert out.shape == (B, S, D)

    # --- emb=None path exercises the specialized no-emb kernel (no zeros DMA) ---
    out_ne = mlp_block_forward(x, a1, be1, wc, bc, a2, be2, wl_t, bl, emb=None)
    out_ne = jax.block_until_ready(out_ne)
    ref_ne = mlp_block_ref(x, a1, be1, wc, bc, a2, be2, wl_t, bl, emb=None)
    np.testing.assert_allclose(np.asarray(out_ne), np.asarray(ref_ne), rtol=1e-4, atol=1e-4)

    print("KERNEL_OK")
</pallas_src>

<mosaic_0001>
module attributes {stable_mosaic.version = 11 : i64} {
  func.func @kernel(%arg0: i32, %arg1: memref<1x16x128xf32, #tpu.memory_space<vmem>>, %arg2: memref<1x16x128xf32, #tpu.memory_space<vmem>>, %arg3: memref<1x128xf32, #tpu.memory_space<vmem>>, %arg4: memref<1x128xf32, #tpu.memory_space<vmem>>, %arg5: memref<16x16xf32, #tpu.memory_space<vmem>>, %arg6: memref<16x128xf32, #tpu.memory_space<vmem>>, %arg7: memref<1x128xf32, #tpu.memory_space<vmem>>, %arg8: memref<1x128xf32, #tpu.memory_space<vmem>>, %arg9: memref<128x128xf32, #tpu.memory_space<vmem>>, %arg10: memref<1x128xf32, #tpu.memory_space<vmem>>, %arg11: memref<1x16x128xf32, #tpu.memory_space<vmem>>) attributes {dimension_semantics = [#tpu.dimension_semantics<parallel>], iteration_bounds = array<i64: 2>, scalar_prefetch = 0 : i64, scratch_operands = 0 : i64, tpu.core_type = #tpu.core_type<tc>, window_params = [{transform_indices = @transform_0, window_bounds = array<i64: 1, 16, 128>}, {transform_indices = @transform_1, window_bounds = array<i64: 1, 16, 128>}, {pipeline_mode = #tpu.pipeline_mode<synchronous>, transform_indices = @transform_2, window_bounds = array<i64: 1, 128>}, {pipeline_mode = #tpu.pipeline_mode<synchronous>, transform_indices = @transform_3, window_bounds = array<i64: 1, 128>}, {pipeline_mode = #tpu.pipeline_mode<synchronous>, transform_indices = @transform_4, window_bounds = array<i64: 16, 16>}, {pipeline_mode = #tpu.pipeline_mode<synchronous>, transform_indices = @transform_5, window_bounds = array<i64: 16, 128>}, {pipeline_mode = #tpu.pipeline_mode<synchronous>, transform_indices = @transform_6, window_bounds = array<i64: 1, 128>}, {pipeline_mode = #tpu.pipeline_mode<synchronous>, transform_indices = @transform_7, window_bounds = array<i64: 1, 128>}, {pipeline_mode = #tpu.pipeline_mode<synchronous>, transform_indices = @transform_8, window_bounds = array<i64: 128, 128>}, {pipeline_mode = #tpu.pipeline_mode<synchronous>, transform_indices = @transform_9, window_bounds = array<i64: 1, 128>}, {transform_indices = @transform_10, window_bounds = array<i64: 1, 16, 128>}]} {
    %c0 = arith.constant 0 : index
    %c0_0 = arith.constant 0 : index
    %c0_1 = arith.constant 0 : index
    %0 = vector.load %arg1[%c0, %c0_0, %c0_1] : memref<1x16x128xf32, #tpu.memory_space<vmem>>, vector<1x16x128xf32>
    %c0_2 = arith.constant 0 : index
    %c0_3 = arith.constant 0 : index
    %c0_4 = arith.constant 0 : index
    %1 = vector.load %arg2[%c0_2, %c0_3, %c0_4] : memref<1x16x128xf32, #tpu.memory_space<vmem>>, vector<1x16x128xf32>
    %2 = arith.addf %0, %1 : vector<1x16x128xf32>
    %cst = arith.constant dense<0.000000e+00> : vector<1x16xf32>
    %3 = vector.multi_reduction <add>, %2, %cst [2] : vector<1x16x128xf32> to vector<1x16xf32>
    %4 = vector.shape_cast %3 : vector<1x16xf32> to vector<1x16x1xf32>
    %cst_5 = arith.constant 1.280000e+02 : f32
    %5 = vector.broadcast %cst_5 : f32 to vector<1x16x1xf32>
    %6 = arith.divf %4, %5 : vector<1x16x1xf32>
    %7 = vector.broadcast %6 : vector<1x16x1xf32> to vector<1x16x128xf32>
    %8 = arith.subf %2, %7 : vector<1x16x128xf32>
    %9 = arith.mulf %8, %8 : vector<1x16x128xf32>
    %cst_6 = arith.constant dense<0.000000e+00> : vector<1x16xf32>
    %10 = vector.multi_reduction <add>, %9, %cst_6 [2] : vector<1x16x128xf32> to vector<1x16xf32>
    %11 = vector.shape_cast %10 : vector<1x16xf32> to vector<1x16x1xf32>
    %cst_7 = arith.constant 1.280000e+02 : f32
    %12 = vector.broadcast %cst_7 : f32 to vector<1x16x1xf32>
    %13 = arith.divf %11, %12 : vector<1x16x1xf32>
    %14 = vector.broadcast %6 : vector<1x16x1xf32> to vector<1x16x128xf32>
    %15 = arith.subf %2, %14 : vector<1x16x128xf32>
    %cst_8 = arith.constant 9.99999974E-6 : f32
    %16 = vector.broadcast %cst_8 : f32 to vector<1x16x1xf32>
    %17 = arith.addf %13, %16 : vector<1x16x1xf32>
    %18 = math.rsqrt %17 : vector<1x16x1xf32>
    %19 = vector.broadcast %18 : vector<1x16x1xf32> to vector<1x16x128xf32>
    %20 = arith.mulf %15, %19 : vector<1x16x128xf32>
    %c0_9 = arith.constant 0 : index
    %c0_10 = arith.constant 0 : index
    %21 = vector.load %arg3[%c0_9, %c0_10] : memref<1x128xf32, #tpu.memory_space<vmem>>, vector<1x128xf32>
    %22 = vector.shape_cast %21 : vector<1x128xf32> to vector<1x1x128xf32>
    %23 = vector.broadcast %22 : vector<1x1x128xf32> to vector<1x16x128xf32>
    %24 = arith.mulf %20, %23 : vector<1x16x128xf32>
    %c0_11 = arith.constant 0 : index
    %c0_12 = arith.constant 0 : index
    %25 = vector.load %arg4[%c0_11, %c0_12] : memref<1x128xf32, #tpu.memory_space<vmem>>, vector<1x128xf32>
    %26 = vector.shape_cast %25 : vector<1x128xf32> to vector<1x1x128xf32>
    %27 = vector.broadcast %26 : vector<1x1x128xf32> to vector<1x16x128xf32>
    %28 = arith.addf %24, %27 : vector<1x16x128xf32>
    %c0_13 = arith.constant 0 : index
    %c0_14 = arith.constant 0 : index
    %29 = vector.load %arg5[%c0_13, %c0_14] : memref<16x16xf32, #tpu.memory_space<vmem>>, vector<16x16xf32>
    %30 = vector.shape_cast %29 : vector<16x16xf32> to vector<1x16x16xf32>
    "tpu.trace_start"() <{level = 10 : i32, message = "bos,bsd->bod"}> : () -> ()
    %cst_15 = arith.constant dense<0.000000e+00> : vector<1x16x128xf32>
    %31 = tpu.matmul %30, %28, %cst_15 {dimension_numbers = #tpu.dot_dimension_numbers<[2], [1], [1], [2], [0, 0, 0, 1, 1, 2], [0], [0]>} : vector<1x16x16xf32>, vector<1x16x128xf32>, vector<1x16x128xf32> -> vector<1x16x128xf32>
    "tpu.trace_stop"() : () -> ()
    %c0_16 = arith.constant 0 : index
    %c0_17 = arith.constant 0 : index
    %32 = vector.load %arg6[%c0_16, %c0_17] : memref<16x128xf32, #tpu.memory_space<vmem>>, vector<16x128xf32>
    %33 = vector.shape_cast %32 : vector<16x128xf32> to vector<1x16x128xf32>
    %34 = arith.addf %31, %33 : vector<1x16x128xf32>
    %35 = arith.negf %34 : vector<1x16x128xf32>
    %36 = math.exp %35 : vector<1x16x128xf32>
    %cst_18 = arith.constant 1.000000e+00 : f32
    %37 = vector.broadcast %cst_18 : f32 to vector<1x16x128xf32>
    %38 = arith.addf %37, %36 : vector<1x16x128xf32>
    %39 = arith.divf %37, %38 : vector<1x16x128xf32>
    %40 = arith.mulf %34, %39 : vector<1x16x128xf32>
    %41 = arith.addf %2, %40 : vector<1x16x128xf32>
    %cst_19 = arith.constant dense<0.000000e+00> : vector<1x16xf32>
    %42 = vector.multi_reduction <add>, %41, %cst_19 [2] : vector<1x16x128xf32> to vector<1x16xf32>
    %43 = vector.shape_cast %42 : vector<1x16xf32> to vector<1x16x1xf32>
    %cst_20 = arith.constant 1.280000e+02 : f32
    %44 = vector.broadcast %cst_20 : f32 to vector<1x16x1xf32>
    %45 = arith.divf %43, %44 : vector<1x16x1xf32>
    %46 = vector.broadcast %45 : vector<1x16x1xf32> to vector<1x16x128xf32>
    %47 = arith.subf %41, %46 : vector<1x16x128xf32>
    %48 = arith.mulf %47, %47 : vector<1x16x128xf32>
    %cst_21 = arith.constant dense<0.000000e+00> : vector<1x16xf32>
    %49 = vector.multi_reduction <add>, %48, %cst_21 [2] : vector<1x16x128xf32> to vector<1x16xf32>
    %50 = vector.shape_cast %49 : vector<1x16xf32> to vector<1x16x1xf32>
    %cst_22 = arith.constant 1.280000e+02 : f32
    %51 = vector.broadcast %cst_22 : f32 to vector<1x16x1xf32>
    %52 = arith.divf %50, %51 : vector<1x16x1xf32>
    %53 = vector.broadcast %45 : vector<1x16x1xf32> to vector<1x16x128xf32>
    %54 = arith.subf %41, %53 : vector<1x16x128xf32>
    %cst_23 = arith.constant 9.99999974E-6 : f32
    %55 = vector.broadcast %cst_23 : f32 to vector<1x16x1xf32>
    %56 = arith.addf %52, %55 : vector<1x16x1xf32>
    %57 = math.rsqrt %56 : vector<1x16x1xf32>
    %58 = vector.broadcast %57 : vector<1x16x1xf32> to vector<1x16x128xf32>
    %59 = arith.mulf %54, %58 : vector<1x16x128xf32>
    %c0_24 = arith.constant 0 : index
    %c0_25 = arith.constant 0 : index
    %60 = vector.load %arg7[%c0_24, %c0_25] : memref<1x128xf32, #tpu.memory_space<vmem>>, vector<1x128xf32>
    %61 = vector.shape_cast %60 : vector<1x128xf32> to vector<1x1x128xf32>
    %62 = vector.broadcast %61 : vector<1x1x128xf32> to vector<1x16x128xf32>
    %63 = arith.mulf %59, %62 : vector<1x16x128xf32>
    %c0_26 = arith.constant 0 : index
    %c0_27 = arith.constant 0 : index
    %64 = vector.load %arg8[%c0_26, %c0_27] : memref<1x128xf32, #tpu.memory_space<vmem>>, vector<1x128xf32>
    %65 = vector.shape_cast %64 : vector<1x128xf32> to vector<1x1x128xf32>
    %66 = vector.broadcast %65 : vector<1x1x128xf32> to vector<1x16x128xf32>
    %67 = arith.addf %63, %66 : vector<1x16x128xf32>
    %68 = vector.shape_cast %67 : vector<1x16x128xf32> to vector<16x128xf32>
    %c0_28 = arith.constant 0 : index
    %c0_29 = arith.constant 0 : index
    %69 = vector.load %arg9[%c0_28, %c0_29] : memref<128x128xf32, #tpu.memory_space<vmem>>, vector<128x128xf32>
    %cst_30 = arith.constant dense<0.000000e+00> : vector<16x128xf32>
    %70 = tpu.matmul %68, %69, %cst_30 {dimension_numbers = #tpu.dot_dimension_numbers<[1], [0], [0], [1], [0, 0, 1, 1], [], []>} : vector<16x128xf32>, vector<128x128xf32>, vector<16x128xf32> -> vector<16x128xf32>
    %c0_31 = arith.constant 0 : index
    %c0_32 = arith.constant 0 : index
    %71 = vector.load %arg10[%c0_31, %c0_32] : memref<1x128xf32, #tpu.memory_space<vmem>>, vector<1x128xf32>
    %72 = vector.broadcast %71 : vector<1x128xf32> to vector<16x128xf32>
    %73 = arith.addf %70, %72 : vector<16x128xf32>
    %74 = arith.negf %73 : vector<16x128xf32>
    %75 = math.exp %74 : vector<16x128xf32>
    %cst_33 = arith.constant 1.000000e+00 : f32
    %76 = vector.broadcast %cst_33 : f32 to vector<16x128xf32>
    %77 = arith.addf %76, %75 : vector<16x128xf32>
    %78 = arith.divf %76, %77 : vector<16x128xf32>
    %79 = arith.mulf %73, %78 : vector<16x128xf32>
    %80 = vector.shape_cast %79 : vector<16x128xf32> to vector<1x16x128xf32>
    %81 = arith.addf %41, %80 : vector<1x16x128xf32>
    %c0_34 = arith.constant 0 : index
    %c0_35 = arith.constant 0 : index
    %c0_36 = arith.constant 0 : index
    %82 = vector.load %arg11[%c0_34, %c0_35, %c0_36] : memref<1x16x128xf32, #tpu.memory_space<vmem>>, vector<1x16x128xf32>
    tpu.vector_store %arg11[%c0_34, %c0_35, %c0_36], %81 {strides = array<i32>} : memref<1x16x128xf32, #tpu.memory_space<vmem>>, vector<1x16x128xf32>,
    return
  }
  func.func @transform_0(%arg0: i32) -> (i32, i32, i32) {
    %c0_i32 = arith.constant 0 : i32
    %c0_i32_0 = arith.constant 0 : i32
    %c0_i32_1 = arith.constant 0 : i32
    return %arg0, %c0_i32, %c0_i32_0 : i32, i32, i32
  }
  func.func @transform_1(%arg0: i32) -> (i32, i32, i32) {
    %c0_i32 = arith.constant 0 : i32
    %c0_i32_0 = arith.constant 0 : i32
    %c0_i32_1 = arith.constant 0 : i32
    return %arg0, %c0_i32, %c0_i32_0 : i32, i32, i32
  }
  func.func @transform_2(%arg0: i32) -> (i32, i32) {
    %c0_i32 = arith.constant 0 : i32
    %c0_i32_0 = arith.constant 0 : i32
    %c0_i32_1 = arith.constant 0 : i32
    return %c0_i32, %c0_i32_0 : i32, i32
  }
  func.func @transform_3(%arg0: i32) -> (i32, i32) {
    %c0_i32 = arith.constant 0 : i32
    %c0_i32_0 = arith.constant 0 : i32
    %c0_i32_1 = arith.constant 0 : i32
    return %c0_i32, %c0_i32_0 : i32, i32
  }
  func.func @transform_4(%arg0: i32) -> (i32, i32) {
    %c0_i32 = arith.constant 0 : i32
    %c0_i32_0 = arith.constant 0 : i32
    %c0_i32_1 = arith.constant 0 : i32
    return %c0_i32, %c0_i32_0 : i32, i32
  }
  func.func @transform_5(%arg0: i32) -> (i32, i32) {
    %c0_i32 = arith.constant 0 : i32
    %c0_i32_0 = arith.constant 0 : i32
    %c0_i32_1 = arith.constant 0 : i32
    return %c0_i32, %c0_i32_0 : i32, i32
  }
  func.func @transform_6(%arg0: i32) -> (i32, i32) {
    %c0_i32 = arith.constant 0 : i32
    %c0_i32_0 = arith.constant 0 : i32
    %c0_i32_1 = arith.constant 0 : i32
    return %c0_i32, %c0_i32_0 : i32, i32
  }
  func.func @transform_7(%arg0: i32) -> (i32, i32) {
    %c0_i32 = arith.constant 0 : i32
    %c0_i32_0 = arith.constant 0 : i32
    %c0_i32_1 = arith.constant 0 : i32
    return %c0_i32, %c0_i32_0 : i32, i32
  }
  func.func @transform_8(%arg0: i32) -> (i32, i32) {
    %c0_i32 = arith.constant 0 : i32
    %c0_i32_0 = arith.constant 0 : i32
    %c0_i32_1 = arith.constant 0 : i32
    return %c0_i32, %c0_i32_0 : i32, i32
  }
  func.func @transform_9(%arg0: i32) -> (i32, i32) {
    %c0_i32 = arith.constant 0 : i32
    %c0_i32_0 = arith.constant 0 : i32
    %c0_i32_1 = arith.constant 0 : i32
    return %c0_i32, %c0_i32_0 : i32, i32
  }
  func.func @transform_10(%arg0: i32) -> (i32, i32, i32) {
    %c0_i32 = arith.constant 0 : i32
    %c0_i32_0 = arith.constant 0 : i32
    %c0_i32_1 = arith.constant 0 : i32
    return %arg0, %c0_i32, %c0_i32_0 : i32, i32, i32
  }
}

</mosaic_0001>

<bundles_post_ra>
// kernel: tpu_custom_call.1
= control target key start
LH: loop header
LB: loop body
LE: loop exit
PB: predicated region body
PF: predicated region fallthrough
CT: control target
= control target key end

     0   :  { %s2214_s0 = inlined_call_operand.hbm [shape: f32[2,16,128], index: 0, kind: input, shape index: {}]   ;;  %s2215_s1 = inlined_call_operand.hbm [shape: f32[2,16,128], index: 1, kind: input, shape index: {}]   ;;  %s2216_s2 = inlined_call_operand.hbm [shape: f32[1,128], index: 2, kind: input, shape index: {}]   ;;  %s2217_s3 = inlined_call_operand.hbm [shape: f32[1,128], index: 3, kind: input, shape index: {}]   ;;  %s2218_s4 = inlined_call_operand.hbm [shape: f32[16,16], index: 4, kind: input, shape index: {}]   ;;  %s2219_s5 = inlined_call_operand.hbm [shape: f32[16,128], index: 5, kind: input, shape index: {}]   ;;  %s2220_s6 = inlined_call_operand.hbm [shape: f32[1,128], index: 6, kind: input, shape index: {}]   ;;  %s2221_s7 = inlined_call_operand.hbm [shape: f32[1,128], index: 7, kind: input, shape index: {}]   ;;  %s2222_s8 = inlined_call_operand.hbm [shape: f32[128,128], index: 8, kind: input, shape index: {}]   ;;  %s2223_s9 = inlined_call_operand.hbm [shape: f32[1,128], index: 9, kind: input, shape index: {}]   ;;  %s2224_s10 = inlined_call_operand.hbm [shape: f32[2,16,128], index: 10, kind: output, shape index: {}]  }
   0x1   :  { %2234 = sst [smem:[#allocation29_spill]] %s2214_s0 }
   0x2   :  { %2235 = sst [smem:[#allocation30_spill]] %s2216_s2 }
   0x3   :  { %2236 = sst [smem:[#allocation31_spill]] %s2217_s3 }
   0x4   :  { %2237 = sst [smem:[#allocation32_spill]] %s2218_s4 }
   0x5   :  { %2238 = sst [smem:[#allocation33_spill]] %s2219_s5 }
   0x6   :  { %2239 = sst [smem:[#allocation34_spill]] %s2224_s10 }
   0x7   :  { %15 = vsyncpa [#allocation3], 0 }
   0x8   :  { %17 = vsyncpa [#allocation3 + $0x1], 0 }
   0x9   :  { %18 = vsyncpa [#allocation6], 0 }
   0xa   :  { %20 = vsyncpa [#allocation6 + $0x1], 0 }
   0xb   :  { %21 = vsyncpa [#allocation9], 0 }
   0xc   :  { %22 = vsyncpa [#allocation12], 0 }
   0xd   :  { %23 = vsyncpa [#allocation15], 0 }
   0xe   :  { %24 = vsyncpa [#allocation18], 0 }
   0xf   :  { %25 = vsyncpa [#allocation4], 0 }
  0x10   :  { %27 = vsyncpa [#allocation4 + $0x1], 0  ;;  %s1769_s13 = smov 0   ;;  %s1771_s14 = smov 0  }
  0x11   :  { %s1773_s15 = smov 0   ;;  %s1775_s16 = smov 0  }
  0x12 LB: > { %s1699_s17 = smov [#allocation7]   ;;  %s1790_s19 = sadd.s32 4294967295, %s1697_s16   ;;  %s1697_s16 = sphi %s1775_s16, %s2276_s16   ;;  %s1693_s15 = sphi %s1773_s15, %s2275_s15   ;;  %s1689_s14 = sphi %s1771_s14, %s2274_s14   ;;  %s1685_s13 = sphi %s1769_s13, %s2273_s13  }
  0x13   : > { %s297_s18 = sshll.u32 %s1699_s17, 4  ;;  %p1016_p0 = scmp.ge.s32.totalorder %s1697_s16, 1  ;;  %s1795_s18 = int_to_ptr.vmem [resolvable:$true] %s297_s18 }
  0x14   : > { %p2227_p1 = scmp.eq.s32.totalorder %s1790_s19, 0  ;;  %p284_p2 = scmp.lt.s32.totalorder %s1697_s16, 3 }
  0x15   : > { %s1700_s21 = smov [#allocation8]   ;;  %s1701_s24 = smov [#allocation11]  }
  0x16   : > { %p1797_p3 = pnand %p1016_p0, %p284_p2  ;;  %s308_s22 = sshll.u32 %s1700_s21, 4  ;;  %s1804_s22 = int_to_ptr.vmem [resolvable:$true] %s308_s22 }
  0x17   : > { %s331_s25 = sshll.u32 %s1701_s24, 4  ;;  %s2243_s2 = sld [smem:[#allocation30_spill]]  ;;  %s1812_s25 = int_to_ptr.vmem [resolvable:$true] %s331_s25 }
  0x18   : > { %s2240_s20 = scalar_select %p1797_p3, 1, 0 }
  0x19   : > { %p1201_p5 = pneg %p1797_p3 }
  0x1a   : > { %2241 = sst [smem:[#allocation28_spill]] %s2240_s20 }
  0x1b   : > { %p1808_p6 = pnand %p1201_p5, %p2227_p1 }
  0x1d   : > { %s1323_s28 = scalar_lea.hbm %s2243_s2, 16  ;;  %p1822_p8 = pneg %p1808_p6 }
  0x1e   : > { %p1324_p7 = scmp.ne.s32.totalorder %s2243_s2, %s1323_s28  ;;  %p1330_p11 = scmp.lt.u32.totalorder %s1323_s28, %s2243_s2 }
  0x20   : > { %p1326_p9 = pnand %p1822_p8, %p1324_p7 }
  0x22   : > { %p1327_p10 = pneg %p1326_p9 }
  0x24   : > { %p1332_p12 = pnand %p1330_p11, %p1327_p10 }
  0x26   : > { %1335 = shalt.err (!%p1332_p12)
}
  0x27   : > { %s1336_s21 = scalar_lea.vmem %s1795_s18, 16  ;;  %s1343_s24 = scalar_lea.vmem %s1795_s18, 32 }
  0x28   : > { %p1337_p13 = scmp.ne.s32.totalorder %s1795_s18, %s1336_s21  ;;  %p1344_p5 = scmp.lt.s32.totalorder %s1795_s18, %s1795_s18 }
  0x29   : > { %p1345_p7 = scmp.lt.s32.totalorder %s1343_s24, %s1336_s21 }
  0x2a   : > { %p1339_p0 = pnand %p1337_p13, %p1822_p8 }
  0x2b   : > { %p1346_p9 = por %p1345_p7, %p1344_p5 }
  0x2c   : > { %p1340_p2 = pneg %p1339_p0 }
  0x2e   : > { %p1347_p4 = pnand %p1346_p9, %p1340_p2 }
  0x30   : > { %1350 = shalt.err (!%p1347_p4)
}
  0x31   : > { %1204 = dma.hbm_to_vmem [thread:$0]  (!%p1808_p6), %s2243_s2, 16, %s1795_s18, [#allocation6]  }
  0x32   : > { %s2245_s3 = sld [smem:[#allocation31_spill]] }
  0x38   : > { %s1351_s30 = scalar_lea.hbm %s2245_s3, 16 }
  0x39   : > { %p1352_p10 = scmp.ne.s32.totalorder %s2245_s3, %s1351_s30  ;;  %p1358_p4 = scmp.lt.u32.totalorder %s1351_s30, %s2245_s3 }
  0x3b   : > { %p1354_p11 = pnand %p1352_p10, %p1822_p8 }
  0x3d   : > { %p1355_p12 = pneg %p1354_p11 }
  0x3f   : > { %p1360_p13 = pnand %p1358_p4, %p1355_p12 }
  0x41   : > { %1363 = shalt.err (!%p1360_p13)
}
  0x42   : > { %s1364_s18 = scalar_lea.vmem %s1804_s22, 16  ;;  %s1371_s26 = scalar_lea.vmem %s1804_s22, 32 }
  0x43   : > { %p1365_p0 = scmp.ne.s32.totalorder %s1804_s22, %s1364_s18  ;;  %p1372_p7 = scmp.lt.s32.totalorder %s1804_s22, %s1804_s22 }
  0x44   : > { %p1373_p9 = scmp.lt.s32.totalorder %s1371_s26, %s1364_s18 }
  0x45   : > { %p1367_p2 = pnand %p1365_p0, %p1822_p8 }
  0x46   : > { %p1374_p10 = por %p1373_p9, %p1372_p7 }
  0x47   : > { %p1368_p5 = pneg %p1367_p2 }
  0x49   : > { %p1375_p11 = pnand %p1374_p10, %p1368_p5 }
  0x4b   : > { %1378 = shalt.err (!%p1375_p11)
}
  0x4c   : > { %1207 = dma.hbm_to_vmem [thread:$0]  (!%p1808_p6), %s2245_s3, 16, %s1804_s22, [#allocation9]  }
  0x4d   : > { %s2246_s5 = sld [smem:[#allocation33_spill]] }
  0x53   : > { %s1379_s12 = scalar_lea.hbm %s2246_s5, 256 }
  0x54   : > { %p1380_p12 = scmp.ne.s32.totalorder %s2246_s5, %s1379_s12  ;;  %p1386_p0 = scmp.lt.u32.totalorder %s1379_s12, %s2246_s5 }
  0x56   : > { %p1382_p4 = pnand %p1380_p12, %p1822_p8 }
  0x58   : > { %p1383_p13 = pneg %p1382_p4 }
  0x5a   : > { %p1388_p2 = pnand %p1386_p0, %p1383_p13 }
  0x5c   : > { %1391 = shalt.err (!%p1388_p2)
}
  0x5d   : > { %s1392_s22 = scalar_lea.vmem %s1812_s25, 256  ;;  %p1400_p10 = scmp.lt.s32.totalorder %s1812_s25, %s1812_s25 }
  0x5e   : > { %p1393_p5 = scmp.ne.s32.totalorder %s1812_s25, %s1392_s22  ;;  %p1401_p11 = scmp.lt.s32.totalorder %s1392_s22, %s1392_s22 }
  0x60   : > { %p1395_p7 = pnand %p1393_p5, %p1822_p8  ;;  %p1402_p12 = por %p1401_p11, %p1400_p10 }
  0x62   : > { %p1396_p9 = pneg %p1395_p7 }
  0x64   : > { %p1403_p4 = pnand %p1402_p12, %p1396_p9 }
  0x66   : > { %1406 = shalt.err (!%p1403_p4)
}
  0x67   : > { %s2229_s26 = smov 128   ;;  %s2231_s27 = smov 8  }
  0x68   : > { %1213 = dma.hbm_to_vmem [thread:$0]  (!%p1808_p6), %s2246_s5, 256, %s1812_s25, [#allocation12], %s2229_s26, %s2229_s26, %s2231_s27  }
  0x69   : > { %s1704_s30 = smov [#allocation14]   ;;  %s1705_s17 = smov [#allocation10]  }
  0x6a   : > { %s356_s12 = sshll.u32 %s1704_s30, 4  ;;  %s318_s21 = sshll.u32 %s1705_s17, 4  ;;  %s357_s12 = int_to_ptr.vmem [resolvable:$true] %s356_s12  ;;  %s319_s21 = int_to_ptr.vmem [resolvable:$true] %s318_s21 }
  0x6b   : > { %s1407_s22 = scalar_lea.hbm %s2221_s7, 16 }
  0x6c   : > { %p1408_p13 = scmp.ne.s32.totalorder %s2221_s7, %s1407_s22  ;;  %p1414_p5 = scmp.lt.u32.totalorder %s1407_s22, %s2221_s7 }
  0x6e   : > { %p1410_p0 = pnand %p1408_p13, %p1822_p8 }
  0x70   : > { %p1411_p2 = pneg %p1410_p0 }
  0x72   : > { %p1416_p7 = pnand %p1414_p5, %p1411_p2 }
  0x74   : > { %1419 = shalt.err (!%p1416_p7)
}
  0x75   : > { %s1420_s25 = scalar_lea.vmem %s357_s12, 16  ;;  %s1427_s28 = scalar_lea.vmem %s357_s12, 32 }
  0x76   : > { %p1421_p9 = scmp.ne.s32.totalorder %s357_s12, %s1420_s25  ;;  %p1428_p12 = scmp.lt.s32.totalorder %s357_s12, %s357_s12 }
  0x77   : > { %p1429_p4 = scmp.lt.s32.totalorder %s1427_s28, %s1420_s25 }
  0x78   : > { %p1423_p10 = pnand %p1421_p9, %p1822_p8 }
  0x79   : > { %p1430_p1 = por %p1429_p4, %p1428_p12 }
  0x7a   : > { %p1424_p11 = pneg %p1423_p10 }
  0x7c   : > { %p1431_p3 = pnand %p1430_p1, %p1424_p11 }
  0x7e   : > { %1434 = shalt.err (!%p1431_p3)
}
  0x7f   : > { %1219 = dma.hbm_to_vmem [thread:$0]  (!%p1808_p6), %s2221_s7, 16, %s357_s12, [#allocation15]  }
  0x80   : > { %s2247_s4 = sld [smem:[#allocation32_spill]] }
  0x86   : > { %s1435_s29 = scalar_lea.hbm %s2247_s4, 256 }
  0x87   : > { %p1436_p13 = scmp.ne.s32.totalorder %s2247_s4, %s1435_s29  ;;  %p1442_p3 = scmp.lt.u32.totalorder %s1435_s29, %s2247_s4 }
  0x89   : > { %p1438_p0 = pnand %p1436_p13, %p1822_p8 }
  0x8b   : > { %p1439_p1 = pneg %p1438_p0 }
  0x8d   : > { %p1444_p2 = pnand %p1442_p3, %p1439_p1 }
  0x8f   : > { %1447 = shalt.err (!%p1444_p2)
}
  0x90   : > { %s1448_s22 = scalar_lea.vmem %s319_s21, 256  ;;  %p1456_p10 = scmp.lt.s32.totalorder %s319_s21, %s319_s21 }
  0x91   : > { %p1449_p5 = scmp.ne.s32.totalorder %s319_s21, %s1448_s22  ;;  %p1457_p11 = scmp.lt.s32.totalorder %s1448_s22, %s1448_s22 }
  0x93   : > { %p1451_p7 = pnand %p1449_p5, %p1822_p8  ;;  %p1458_p12 = por %p1457_p11, %p1456_p10 }
  0x95   : > { %p1452_p9 = pneg %p1451_p7 }
  0x97   : > { %p1459_p4 = pnand %p1458_p12, %p1452_p9 }
  0x99   : > { %1462 = shalt.err (!%p1459_p4)
}
  0x9a   : > { %1210 = dma.hbm_to_vmem [thread:$0]  (!%p1808_p6), %s2247_s4, 256, %s319_s21, [#allocation9], %s2229_s26, %s2229_s26, %s2231_s27  }
  0x9b   : > { %s1706_s28 = smov [#allocation13]   ;;  %s1707_s3 = smov [#allocation16]  }
  0x9c   : > { %s345_s2 = sshll.u32 %s1706_s28, 4  ;;  %s366_s10 = sshll.u32 %s1707_s3, 4  ;;  %s346_s2 = int_to_ptr.vmem [resolvable:$true] %s345_s2  ;;  %s367_s10 = int_to_ptr.vmem [resolvable:$true] %s366_s10 }
  0x9d   : > { %s1463_s30 = scalar_lea.hbm %s2220_s6, 16 }
  0x9e   : > { %p1464_p13 = scmp.ne.s32.totalorder %s2220_s6, %s1463_s30  ;;  %p1470_p3 = scmp.lt.u32.totalorder %s1463_s30, %s2220_s6 }
  0xa0   : > { %p1466_p0 = pnand %p1464_p13, %p1822_p8 }
  0xa2   : > { %p1467_p1 = pneg %p1466_p0 }
  0xa4   : > { %p1472_p2 = pnand %p1470_p3, %p1467_p1 }
  0xa6   : > { %1475 = shalt.err (!%p1472_p2)
}
  0xa7   : > { %s1476_s21 = scalar_lea.vmem %s346_s2, 16  ;;  %s1483_s12 = scalar_lea.vmem %s346_s2, 32 }
  0xa8   : > { %p1477_p5 = scmp.ne.s32.totalorder %s346_s2, %s1476_s21  ;;  %p1484_p10 = scmp.lt.s32.totalorder %s346_s2, %s346_s2 }
  0xa9   : > { %p1485_p11 = scmp.lt.s32.totalorder %s1483_s12, %s1476_s21 }
  0xaa   : > { %p1479_p7 = pnand %p1477_p5, %p1822_p8 }
  0xab   : > { %p1486_p12 = por %p1485_p11, %p1484_p10 }
  0xac   : > { %p1480_p9 = pneg %p1479_p7 }
  0xae   : > { %p1487_p4 = pnand %p1486_p12, %p1480_p9 }
  0xb0   : > { %1490 = shalt.err (!%p1487_p4)
}
  0xb1   : > { %1216 = dma.hbm_to_vmem [thread:$0]  (!%p1808_p6), %s2220_s6, 16, %s346_s2, [#allocation12]  }
  0xb2   : > { %s1491_s29 = scalar_lea.hbm %s2222_s8, 2048 }
  0xb3   : > { %p1492_p13 = scmp.ne.s32.totalorder %s2222_s8, %s1491_s29  ;;  %p1498_p3 = scmp.lt.u32.totalorder %s1491_s29, %s2222_s8 }
  0xb5   : > { %p1494_p0 = pnand %p1492_p13, %p1822_p8 }
  0xb7   : > { %p1495_p1 = pneg %p1494_p0 }
  0xb9   : > { %p1500_p2 = pnand %p1498_p3, %p1495_p1 }
  0xbb   : > { %1503 = shalt.err (!%p1500_p2)
}
  0xbc   : > { %s1504_s22 = scalar_lea.vmem %s367_s10, 2048  ;;  %p1512_p10 = scmp.lt.s32.totalorder %s367_s10, %s367_s10 }
  0xbd   : > { %p1505_p5 = scmp.ne.s32.totalorder %s367_s10, %s1504_s22  ;;  %p1513_p11 = scmp.lt.s32.totalorder %s1504_s22, %s1504_s22 }
  0xbf   : > { %p1507_p7 = pnand %p1505_p5, %p1822_p8  ;;  %p1514_p12 = por %p1513_p11, %p1512_p10 }
  0xc1   : > { %p1508_p9 = pneg %p1507_p7 }
  0xc3   : > { %p1515_p4 = pnand %p1514_p12, %p1508_p9 }
  0xc5   : > { %1518 = shalt.err (!%p1515_p4)
}
  0xc6   : > { %1222 = dma.hbm_to_vmem [thread:$0]  (!%p1808_p6), %s2222_s8, 2048, %s367_s10, [#allocation15], %s2229_s26, %s2229_s26, %s2231_s27  }
  0xc7   : > { %s1708_s12 = smov [#allocation17]   ;;  %s1519_s20 = scalar_lea.hbm %s2223_s9, 16 }
  0xc8   : > { %s380_s25 = sshll.u32 %s1708_s12, 4  ;;  %p1520_p13 = scmp.ne.s32.totalorder %s2223_s9, %s1519_s20  ;;  %s381_s25 = int_to_ptr.vmem [resolvable:$true] %s380_s25 }
  0xc9   : > { %p1526_p3 = scmp.lt.u32.totalorder %s1519_s20, %s2223_s9 }
  0xca   : > { %p1522_p0 = pnand %p1520_p13, %p1822_p8 }
  0xcc   : > { %p1523_p1 = pneg %p1522_p0 }
  0xce   : > { %p1528_p2 = pnand %p1526_p3, %p1523_p1 }
  0xd0   : > { %1531 = shalt.err (!%p1528_p2)
}
  0xd1   : > { %s1532_s10 = scalar_lea.vmem %s381_s25, 16  ;;  %s1539_s18 = scalar_lea.vmem %s381_s25, 32 }
  0xd2   : > { %p1533_p5 = scmp.ne.s32.totalorder %s381_s25, %s1532_s10  ;;  %p1540_p10 = scmp.lt.s32.totalorder %s381_s25, %s381_s25 }
  0xd3   : > { %p1541_p11 = scmp.lt.s32.totalorder %s1539_s18, %s1532_s10 }
  0xd4   : > { %p1535_p7 = pnand %p1533_p5, %p1822_p8 }
  0xd5   : > { %p1542_p12 = por %p1541_p11, %p1540_p10 }
  0xd6   : > { %p1536_p9 = pneg %p1535_p7 }
  0xd8   : > { %p1543_p4 = pnand %p1542_p12, %p1536_p9 }
  0xda   : > { %1546 = shalt.err (!%p1543_p4)
}
  0xdb   : > { %1225 = dma.hbm_to_vmem [thread:$0]  (!%p1808_p6), %s2223_s9, 16, %s381_s25, [#allocation18]  }
  0xdc   : > { %s1015_s11 = sadd.s32 4294967294, %s1697_s16   ;;  %s1992_s23 = sadd.s32 1, %s1697_s16  }
  0xdd   : > { %s37_s21 = ssub.s32 %s1697_s16, %s1992_s23  ;;  %s40_s12 = sadd.s32 1, %s1693_s15 }
  0xde   : > { %p38_p8 = scmp.eq.s32.totalorder %s37_s21, 0  ;;  %p47_p13 = scmp.ne.s32.totalorder %s1693_s15, %s1689_s14 }
  0xdf   : > { %p48_p0 = scmp.eq.s32.totalorder %s1697_s16, 0  ;;  %p53_p1 = scmp.ne.s32.totalorder %s1689_s14, %s1685_s13 }
  0xe0   : > { %s2003_s28 = scalar_select %p38_p8, %s1693_s15, %s40_s12  }
  0xe1   : > { %p2005_p3 = por %p48_p0, %p47_p13  ;;  %p2249_p2 = scmp.eq.s32.totalorder %s1790_s19, 0 }
  0xe2   : > { %p271_p5 = scmp.eq.s32.totalorder %s1790_s19, 1  ;;  %p277_p7 = scmp.eq.s32.totalorder %s1015_s11, 1 }
  0xe3   : > { %p2011_p6 = por %p2249_p2, %p53_p1  ;;  %p1245_p9 = scmp.lt.s32.totalorder %s1697_s16, 2 }
  0xe4   : > { %s391_s20 = sand.u32 1, %s1693_s15   ;;  %p2018_p10 = por %p271_p5, %p47_p13 }
  0xe5   : > { %p2022_p11 = por %p277_p7, %p53_p1  ;;  %s1026_s17 = sshll.u32 %s391_s20, 4 }
  0xe6   : > { %s2251_s29 = scalar_select %p2018_p10, 1, 0 }
  0xe7   : > { %s2252_s30 = scalar_select %p2022_p11, 1, 0 }
  0xe8   : > { %s1060_s24 = sshll.u32 %s1697_s16, 8  ;;  %s2253_s0 = sld [smem:[#allocation29_spill]] }
  0xe9   : > { %s395_s2 = scalar_lea.vmem [#allocation2], %s1026_s17  ;;  %p2036_p12 = pnand %p1245_p9, %p2005_p3 }
  0xea   : > { %s402_s11 = sshll.u32 %s395_s2, 4  ;;  %s2043_s10 = scalar_lea.hbm %s2215_s1, %s1060_s24  ;;  %s2032_s11 = int_to_ptr.vmem [resolvable:$true] %s402_s11 }
  0xeb   : > { %s416_s18 = scalar_lea.vmem [#allocation5], %s1026_s17  ;;  %s2047_s4 = scalar_lea.sflag [#allocation3], %s391_s20 }
  0xec   : > { %s2045_s27 = sshll.u32 %s416_s18, 4  ;;  %p1549_p8 = pneg %p2036_p12  ;;  %s2079_s27 = int_to_ptr.vmem [resolvable:$true] %s2045_s27 }
  0xee   : > { %s2030_s22 = scalar_lea.hbm %s2253_s0, %s1060_s24  ;;  %s1552_s26 = scalar_lea.hbm %s2253_s0, 512 }
  0xef   : > { %s1547_s2 = scalar_lea.hbm %s2030_s22, 256  ;;  %p1553_p1 = scmp.lt.u32.totalorder %s2030_s22, %s2253_s0 }
  0xf0   : > { %p1548_p4 = scmp.ne.s32.totalorder %s2030_s22, %s1547_s2  ;;  %p1554_p3 = scmp.lt.u32.totalorder %s1552_s26, %s1547_s2 }
  0xf1   : > { %p1556_p5 = scmp.lt.u32.totalorder %s1547_s2, %s2030_s22 }
  0xf2   : > { %p1550_p13 = pnand %p1549_p8, %p1548_p4  ;;  %p1555_p2 = por %p1554_p3, %p1553_p1 }
  0xf4   : > { %p1551_p0 = pneg %p1550_p13  ;;  %p1557_p7 = por %p1556_p5, %p1555_p2 }
  0xf6   : > { %p1558_p9 = pnand %p1557_p7, %p1551_p0 }
  0xf8   : > { %1561 = shalt.err (!%p1558_p9)
}
  0xf9   : > { %s1562_s20 = scalar_lea.vmem %s2032_s11, 256  ;;  %s1709_s5 = smov [#allocation2]  }
  0xfa   : > { %p1563_p4 = scmp.ne.s32.totalorder %s2032_s11, %s1562_s20  ;;  %s1567_s17 = sshll.u32 %s1709_s5, 4  ;;  %s1568_s17 = int_to_ptr.vmem [resolvable:$false] %s1567_s17 }
  0xfb   : > { %s1569_s18 = scalar_lea.vmem %s1568_s17, 512  ;;  %p1570_p10 = scmp.lt.s32.totalorder %s2032_s11, %s1568_s17 }
  0xfc   : > { %p1565_p13 = pnand %p1563_p4, %p1549_p8  ;;  %p1571_p1 = scmp.lt.s32.totalorder %s1569_s18, %s1562_s20 }
  0xfe   : > { %p1566_p11 = pneg %p1565_p13  ;;  %p1572_p3 = por %p1571_p1, %p1570_p10 }
 0x100   : > { %p1573_p2 = pnand %p1572_p3, %p1566_p11 }
 0x102   : > { %1576 = shalt.err (!%p1573_p2)
}
 0x103   : > { %s2255_s2 = smov 8   ;;  %s2256_s3 = smov 128  }
 0x104   : > { %1229 = dma.hbm_to_vmem [thread:$0]  (!%p2036_p12), %s2030_s22, 256, %s2032_s11, %s2047_s4, %s2256_s3, %s2256_s3, %s2255_s2  }
 0x105   : > { %s412_s26 = sand.u32 1, %s1697_s16   ;;  %s1577_s24 = scalar_lea.hbm %s2043_s10, 256 }
 0x106   : > { %s2082_s12 = scalar_lea.sflag [#allocation6], %s412_s26  ;;  %p1578_p10 = scmp.ne.s32.totalorder %s2043_s10, %s1577_s24 }
 0x107   : > { %s1582_s17 = scalar_lea.hbm %s2215_s1, 512  ;;  %p1583_p5 = scmp.lt.u32.totalorder %s2043_s10, %s2215_s1 }
 0x108   : > { %p1580_p11 = pnand %p1578_p10, %p1549_p8  ;;  %p1584_p7 = scmp.lt.u32.totalorder %s1582_s17, %s1577_s24 }
 0x109   : > { %p1586_p4 = scmp.lt.u32.totalorder %s1577_s24, %s2043_s10 }
 0x10a   : > { %p1581_p0 = pneg %p1580_p11  ;;  %p1585_p9 = por %p1584_p7, %p1583_p5 }
 0x10c   : > { %p1587_p13 = por %p1586_p4, %p1585_p9 }
 0x10e   : > { %p1588_p1 = pnand %p1587_p13, %p1581_p0 }
 0x110   : > { %1591 = shalt.err (!%p1588_p1)
}
 0x111   : > { %s1592_s4 = scalar_lea.vmem %s2079_s27, 256  ;;  %s1710_s22 = smov [#allocation5]  }
 0x112   : > { %p1593_p3 = scmp.ne.s32.totalorder %s2079_s27, %s1592_s4  ;;  %s1597_s11 = sshll.u32 %s1710_s22, 4  ;;  %s1598_s11 = int_to_ptr.vmem [resolvable:$false] %s1597_s11 }
 0x113   : > { %s1599_s0 = scalar_lea.vmem %s1598_s11, 512  ;;  %p1600_p11 = scmp.lt.s32.totalorder %s2079_s27, %s1598_s11 }
 0x114   : > { %p1595_p2 = pnand %p1593_p3, %p1549_p8  ;;  %p1601_p5 = scmp.lt.s32.totalorder %s1599_s0, %s1592_s4 }
 0x116   : > { %p1596_p10 = pneg %p1595_p2  ;;  %p1602_p7 = por %p1601_p5, %p1600_p11 }
 0x118   : > { %p1603_p9 = pnand %p1602_p7, %p1596_p10 }
 0x11a   : > { %1606 = shalt.err (!%p1603_p9)
}
 0x11b   : > { %1232 = dma.hbm_to_vmem [thread:$0]  (!%p2036_p12), %s2043_s10, 256, %s2079_s27, %s2082_s12, %s2256_s3, %s2256_s3, %s2255_s2  }
 0x11c   : > { %s2257_s26 = sld [smem:[#allocation28_spill]] }
 0x122   : > { %p2258_p8 = scmp.ne.s32.totalorder %s2257_s26, 0 }
 0x123   : > { %s2114_s24 = sand.u32 (!%p2258_p8), 1, %s1689_s14  }
 0x124   : > { %435 = sbr.rel (%p2258_p8) target bundleno = 1461 (0x5b5), region = 60  ;;  %s2117_s20 = sshll.u32 (!%p2258_p8), %s2114_s24, 4 }
 0x125   : > { %s438_s21 = scalar_lea.sflag (!%p2258_p8), [#allocation3], %s2114_s24  ;;  %s441_s5 = scalar_lea.vmem (!%p2258_p8), [#allocation2], %s2117_s20 }
 0x12b   : > { %1652 = dma.done.wait (%p2011_p6), %s438_s21, 256  }
 0x12c   : > { %1654 = vsyncadd (%p2011_p6), %s438_s21, 4294967040  ;;  %s446_s27 = sand.u32 1, %s1790_s19   ;;  %s450_s2 = scalar_lea.vmem [#allocation5], %s2117_s20 }
 0x12d   : > { %s447_s10 = scalar_lea.sflag [#allocation6], %s446_s27 }
 0x12e   : > { %1656 = dma.done.wait (%p2011_p6), %s447_s10, 256  }
 0x12f   : > { %1658 = vsyncadd (%p2011_p6), %s447_s10, 4294967040  ;;  %p2259_p12 = scmp.eq.s32.totalorder %s1790_s19, 0 }
 0x131   : > { %1660 = dma.done.wait (%p2259_p12), [#allocation6], 16   ;;  %p2260_p0 = pmov %p2259_p12 }
 0x133   : > { %1662 = vsyncadd (%p2260_p0), [#allocation6], 4294967280  ;;  %p2261_p4 = pmov %p2260_p0 }
 0x134   : > { %p2262_p13 = pmov %p2260_p0 }
 0x135   : > { %1664 = dma.done.wait (%p2261_p4), [#allocation9], 272  }
 0x136   : > { %1666 = vsyncadd (%p2262_p13), [#allocation9], 4294967024  ;;  %p2263_p1 = pmov %p2260_p0 }
 0x137   : > { %p2264_p3 = pmov %p2260_p0 }
 0x138   : > { %1668 = dma.done.wait (%p2263_p1), [#allocation12], 272  }
 0x139   : > { %1670 = vsyncadd (%p2264_p3), [#allocation12], 4294967024  ;;  %p2265_p6 = pmov %p2260_p0 }
 0x13a   : > { %p2266_p2 = pmov %p2260_p0 }
 0x13b   : > { %1672 = dma.done.wait (%p2265_p6), [#allocation15], 2064  }
 0x13c   : > { %1674 = vsyncadd (%p2266_p2), [#allocation15], 4294965232  ;;  %p2267_p10 = pmov %p2260_p0 }
 0x13d   : > { %p2268_p11 = pmov %p2260_p0 }
 0x13e   : > { %1676 = dma.done.wait (%p2267_p10), [#allocation18], 16  }
 0x13f   : > { %1678 = vsyncadd (%p2268_p11), [#allocation18], 4294967280  ;;  %v524_v0 = vld [vmem:[%s441_s5] sm:$0xff]  ;;  %v525_v2 = vld [vmem:[%s441_s5 + $0x8] sm:$0xff]  ;;  %vm575_vm0 = vcmask 130048   ;;  %s523_s25 = scalar_lea.vmem [#allocation19], %s2117_s20 }
 0x140   : > { %v526_v1 = vld [vmem:[%s450_s2] sm:$0xff]  ;;  %v527_v4 = vld [vmem:[%s450_s2 + $0x8] sm:$0xff]  ;;  %s843_s3 = sshll.u32 %s523_s25, 4  ;;  %s1062_s12 = sshll.u32 %s1790_s19, 8  ;;  %s2163_s3 = int_to_ptr.vmem [resolvable:$true] %s843_s3 }
 0x141   : > { %v528_v3 = vadd.f32 %v526_v1, %v524_v0  ;;  %v529_v5 = vadd.f32 %v527_v4, %v525_v2  ;;  %v571_v14 = vld [vmem:[#allocation10] sm:$0xff]  ;;  %v1044_v23 = vld [vmem:[#allocation7] ss:$0 sm:$0xff]  ;;  %v1045_v27 = vld [vmem:[#allocation8] ss:$0 sm:$0xff]  ;;  %s2269_s4 = sld [smem:[#allocation34_spill]] }
 0x142   : > { %1089 = vmatprep.mubr.msk.f32.mxu0 %vm575_vm0, %v571_v14  ;;  %v572_v32 = vld [vmem:[#allocation10 + $0x8] sm:$0xff]  ;;  %v574_v33 = vld [vmem:[#allocation11 + $0x8] sm:$0xff]  ;;  %v573_v34 = vld [vmem:[#allocation11] sm:$0xff]  ;;  %s830_s19 = scalar_lea.sflag [#allocation4], %s2114_s24  ;;  %s1607_s11 = scalar_lea.vmem %s2163_s3, 256 }
 0x143   : > { %530 = vadd.xlane.f32.xlu0 %v528_v3  ;;  %v713_v51 = vld [vmem:[#allocation16] sm:$0xff]  ;;  %v714_v52 = vld [vmem:[#allocation16 + $0x8] sm:$0xff]  ;;  %v715_v53 = vld [vmem:[#allocation16 + $0x10] sm:$0xff]  ;;  %p1608_p5 = scmp.ne.s32.totalorder %s2163_s3, %s1607_s11  ;;  %p2270_p7 = scmp.ne.s32.totalorder %s2251_s29, 0 }
 0x144   : > { %v1131_v54 = vpack.c.bf16 %v714_v52, %v713_v51  ;;  %v716_v55 = vld [vmem:[#allocation16 + $0x18] sm:$0xff]  ;;  %v717_v57 = vld [vmem:[#allocation16 + $0x20] sm:$0xff]  ;;  %v718_v58 = vld [vmem:[#allocation16 + $0x28] sm:$0xff]  ;;  %s1711_s0 = smov [#allocation19]  }
 0x145   : > { %v1135_v56 = vpack.c.bf16 %v716_v55, %v715_v53  ;;  %v1139_v59 = vpack.c.bf16 %v718_v58, %v717_v57  ;;  %v719_v4 = vld [vmem:[#allocation16 + $0x30] sm:$0xff]  ;;  %v726_v14 = vld [vmem:[#allocation16 + $0x68] sm:$0xff]  ;;  %p1609_p9 = pnand %p1608_p5, %p2270_p7  ;;  %s1611_s26 = sshll.u32 %s1711_s0, 4  ;;  %s1612_s26 = int_to_ptr.vmem [resolvable:$false] %s1611_s26 }
 0x146   : > { %1132 = vmatprep.subr.bf16.mxu1 %v1131_v54  ;;  %s1613_s20 = scalar_lea.vmem %s1612_s26, 512  ;;  %p1614_p12 = scmp.lt.s32.totalorder %s2163_s3, %s1612_s26 }
 0x147   : > { %532 = vadd.xlane.f32.xlu0 %v529_v5  ;;  %1134 = vmatpush3.bf16.msra.mxu1 %v1131_v54  ;;  %s2169_s22 = scalar_lea.hbm %s2269_s4, %s1062_s12  ;;  %p1610_p8 = pneg %p1609_p9 }
 0x148   : > { %1136 = vmatprep.subr.bf16.mxu1 %v1135_v56  ;;  %p1615_p0 = scmp.lt.s32.totalorder %s1613_s20, %s1607_s11 }
 0x14a   : > { %p1616_p4 = por %p1615_p0, %p1614_p12 }
 0x14b   : > { %1138 = vmatpush3.bf16.msra.mxu1 %v1135_v56 }
 0x14c   : > { %1140 = vmatprep.subr.bf16.mxu1 %v1139_v59  ;;  %p1617_p13 = pnand %p1616_p4, %p1610_p8 }
 0x14f   : > { %1142 = vmatpush3.bf16.msra.mxu1 %v1139_v59 }
 0x1d0   : > { %v531_v6 = vpop.xlane.xlu0 %530 }
 0x1d1   : > { %v535_v7 = vmul.f32 0.0078125, %v531_v6 }
 0x1d3   : > { %v537_v8 = vsub.f32 %v528_v3, %v535_v7  ;;  %v721_v7 = vld [vmem:[#allocation16 + $0x40] sm:$0xff] }
 0x1d4   : > { %v533_v9 = vpop.xlane.xlu0 %532 }
 0x1d5   : > { %v536_v10 = vmul.f32 0.0078125, %v533_v9  ;;  %v539_v11 = vmul.f32 %v537_v8, %v537_v8 }
 0x1d7   : > { %v538_v12 = vsub.f32 %v529_v5, %v536_v10  ;;  %541 = vadd.xlane.f32.xlu1 %v539_v11  ;;  %v723_v10 = vld [vmem:[#allocation16 + $0x50] sm:$0xff]  ;;  %v724_v11 = vld [vmem:[#allocation16 + $0x58] sm:$0xff] }
 0x1d9   : > { %v540_v13 = vmul.f32 %v538_v12, %v538_v12 }
 0x1db   : > { %543 = vadd.xlane.f32.xlu1 %v540_v13  ;;  %v725_v13 = vld [vmem:[#allocation16 + $0x60] sm:$0xff] }
 0x264   : > { %v542_v15 = vpop.xlane.xlu1 %541 }
 0x265   : > { %v545_v16 = vmul.f32 0.0078125, %v542_v15  ;;  %v1155_v15 = vpack.c.bf16 %v726_v14, %v725_v13 }
 0x267   : > { %v547_v17 = vadd.f32 1e-05, %v545_v16  ;;  %v727_v16 = vld [vmem:[#allocation16 + $0x70] sm:$0xff] }
 0x268   : > { %v544_v18 = vpop.xlane.xlu1 %543 }
 0x269   : > { %1299 = vrsqrt.f32 %v547_v17  ;;  %v546_v19 = vmul.f32 0.0078125, %v544_v18  ;;  %v728_v17 = vld [vmem:[#allocation16 + $0x78] sm:$0xff] }
 0x26a   : > { %v1159_v18 = vpack.c.bf16 %v728_v17, %v727_v16 }
 0x26b   : > { %v548_v20 = vadd.f32 1e-05, %v546_v19 }
 0x26d   : > { %1301 = vrsqrt.f32 %v548_v20 }
 0x273   : > { %v1300_v21 = vpop.eup %1299 }
 0x274   : > { %v551_v22 = vmul.f32 %v1300_v21, %v537_v8  ;;  %v722_v8 = vld [vmem:[#allocation16 + $0x48] sm:$0xff] }
 0x275   : > { %v1147_v9 = vpack.c.bf16 %v722_v8, %v721_v7 }
 0x276   : > { %v560_v26 = vmul.f32 %v1044_v23, %v551_v22 }
 0x277   : > { %v1302_v24 = vpop.eup %1301 }
 0x278   : > { %v552_v25 = vmul.f32 %v1302_v24, %v538_v12  ;;  %v569_v29 = vadd.f32 %v1045_v27, %v560_v26  ;;  %v1151_v12 = vpack.c.bf16 %v724_v11, %v723_v10  ;;  %v1050_v26 = vld [vmem:[#allocation13] ss:$0 sm:$0xff] }
 0x27a   : > { %v561_v28 = vmul.f32 %v1044_v23, %v552_v25 }
 0x27c   : > { %v570_v30 = vadd.f32 %v1045_v27, %v561_v28 }
 0x27e   : > { %v1127_v31 = vpack.c.bf16 %v570_v30, %v569_v29 }
 0x280   : > { %1128 = vmatprep.subr.bf16.mxu0 %v1127_v31 }
 0x281   : > { %1130 = vmatpush3.bf16.msra.mxu0 %v1127_v31  ;;  %v1051_v31 = vld [vmem:[#allocation14] ss:$0 sm:$0xff] }
 0x284   : > { %1090 = vmatmul.mubr.msk.f32.vlgmr.msra.gmra.mrb[0].mxu0 %vm575_vm0, %v572_v32 }
 0x357   : > { %v1091_v35 = vpop.f32.mrb[0].mxu0 }
 0x358   : > { %v654_v36 = vadd.f32 %v1091_v35, %v574_v33  ;;  %v648_v37 = vpop.f32.mrb[1].mxu0  ;;  %v1052_v35 = vld [vmem:[#allocation17] ss:$0 sm:$0xff] }
 0x359   : > { %v649_v38 = vadd.f32 %v648_v37, %v573_v34 }
 0x35a   : > { %v1049_v39 = vmul.f32 -1.442695, %v654_v36 }
 0x35b   : > { %v1048_v40 = vmul.f32 -1.442695, %v649_v38 }
 0x35c   : > { %1303 = vpow2.f32 %v1049_v39 }
 0x35d   : > { %1305 = vpow2.f32 %v1048_v40 }
 0x366   : > { %v1304_v41 = vpop.eup %1303 }
 0x367   : > { %v1306_v42 = vpop.eup %1305  ;;  %v664_v43 = vadd.f32 1.0, %v1304_v41 }
 0x368   : > { %v663_v44 = vadd.f32 1.0, %v1306_v42 }
 0x369   : > { %1307 = vrcp.f32 %v664_v43 }
 0x36a   : > { %1309 = vrcp.f32 %v663_v44 }
 0x373   : > { %v1308_v45 = vpop.eup %1307 }
 0x374   : > { %v1310_v46 = vpop.eup %1309  ;;  %v670_v47 = vmul.f32 %v1308_v45, %v654_v36 }
 0x375   : > { %v669_v48 = vmul.f32 %v1310_v46, %v649_v38 }
 0x376   : > { %v2153_v49 = vadd.f32 %v670_v47, %v529_v5  ;;  %v720_v5 = vld [vmem:[#allocation16 + $0x38] sm:$0xff] }
 0x377   : > { %v2155_v50 = vadd.f32 %v669_v48, %v528_v3  ;;  %v1143_v6 = vpack.c.bf16 %v720_v5, %v719_v4 }
 0x378   : > { %675 = vadd.xlane.f32.xlu1 %v2153_v49 }
 0x379   : > { %673 = vadd.xlane.f32.xlu0 %v2155_v50  ;;  %1144 = vmatprep.subr.bf16.mxu1 %v1143_v6 }
 0x37a   : > { %1146 = vmatpush3.bf16.msra.mxu1 %v1143_v6 }
 0x37b   : > { %1148 = vmatprep.subr.bf16.mxu1 %v1147_v9 }
 0x37e   : > { %1150 = vmatpush3.bf16.msra.mxu1 %v1147_v9 }
 0x37f   : > { %1152 = vmatprep.subr.bf16.mxu1 %v1151_v12 }
 0x382   : > { %1154 = vmatpush3.bf16.msra.mxu1 %v1151_v12 }
 0x383   : > { %1156 = vmatprep.subr.bf16.mxu1 %v1155_v15 }
 0x386   : > { %1158 = vmatpush3.bf16.msra.mxu1 %v1155_v15 }
 0x387   : > { %1160 = vmatprep.subr.bf16.mxu1 %v1159_v18 }
 0x38a   : > { %1162 = vmatpush3.bf16.msra.mxu1 %v1159_v18 }
 0x405   : > { %v676_v60 = vpop.xlane.xlu1 %675 }
 0x406   : > { %v678_v61 = vmul.f32 0.0078125, %v676_v60  ;;  %v674_v62 = vpop.xlane.xlu0 %673 }
 0x407   : > { %v677_v63 = vmul.f32 0.0078125, %v674_v62 }
 0x408   : > { %v680_v0 = vsub.f32 %v2153_v49, %v678_v61 }
 0x409   : > { %v679_v1 = vsub.f32 %v2155_v50, %v677_v63 }
 0x40a   : > { %v682_v2 = vmul.f32 %v680_v0, %v680_v0 }
 0x40b   : > { %v681_v3 = vmul.f32 %v679_v1, %v679_v1 }
 0x40c   : > { %685 = vadd.xlane.f32.xlu1 %v682_v2 }
 0x40d   : > { %683 = vadd.xlane.f32.xlu0 %v681_v3 }
 0x499   : > { %v686_v19 = vpop.xlane.xlu1 %685 }
 0x49a   : > { %v688_v20 = vmul.f32 0.0078125, %v686_v19  ;;  %v684_v21 = vpop.xlane.xlu0 %683 }
 0x49b   : > { %v687_v22 = vmul.f32 0.0078125, %v684_v21 }
 0x49c   : > { %v690_v23 = vadd.f32 1e-05, %v688_v20 }
 0x49d   : > { %v689_v24 = vadd.f32 1e-05, %v687_v22 }
 0x49e   : > { %1311 = vrsqrt.f32 %v690_v23 }
 0x49f   : > { %1313 = vrsqrt.f32 %v689_v24 }
 0x4a8   : > { %v1312_v25 = vpop.eup %1311 }
 0x4a9   : > { %v1314_v27 = vpop.eup %1313  ;;  %v694_v28 = vmul.f32 %v1312_v25, %v680_v0 }
 0x4aa   : > { %v693_v29 = vmul.f32 %v1314_v27, %v679_v1 }
 0x4ab   : > { %v703_v30 = vmul.f32 %v1050_v26, %v694_v28 }
 0x4ac   : > { %v702_v32 = vmul.f32 %v1050_v26, %v693_v29 }
 0x4ad   : > { %v712_v34 = vadd.f32 %v1051_v31, %v703_v30 }
 0x4ae   : > { %v711_v33 = vadd.f32 %v1051_v31, %v702_v32 }
 0x4b0   : > { %1124 = vmatprep.mubr.f32.mxu1 %v711_v33 }
 0x4b1   : > { %1125 = vmatmul.mubr.f32.vlgmr.msra.gmra.mrb[0].mxu1 %v712_v34 }
 0x584   : > { %v1126_v36 = vpop.f32.mrb[0].mxu1 }
 0x585   : > { %v808_v37 = vadd.f32 %v1126_v36, %v1052_v35  ;;  %v802_v38 = vpop.f32.mrb[1].mxu1 }
 0x586   : > { %v803_v39 = vadd.f32 %v1052_v35, %v802_v38 }
 0x587   : > { %v1054_v40 = vmul.f32 -1.442695, %v808_v37 }
 0x588   : > { %v1053_v41 = vmul.f32 -1.442695, %v803_v39 }
 0x589   : > { %1315 = vpow2.f32 %v1054_v40 }
 0x58a   : > { %1317 = vpow2.f32 %v1053_v41 }
 0x593   : > { %v1316_v42 = vpop.eup %1315 }
 0x594   : > { %v1318_v43 = vpop.eup %1317  ;;  %v818_v44 = vadd.f32 1.0, %v1316_v42 }
 0x595   : > { %v817_v45 = vadd.f32 1.0, %v1318_v43 }
 0x596   : > { %1319 = vrcp.f32 %v818_v44 }
 0x597   : > { %1321 = vrcp.f32 %v817_v45 }
 0x5a0   : > { %v1320_v46 = vpop.eup %1319 }
 0x5a1   : > { %v1322_v47 = vpop.eup %1321  ;;  %v824_v48 = vmul.f32 %v1320_v46, %v808_v37 }
 0x5a2   : > { %v823_v51 = vmul.f32 %v1322_v47, %v803_v39 }
 0x5a3   : > { %v826_v52 = vadd.f32 %v824_v48, %v2153_v49 }
 0x5a4   : > { %v825_v53 = vadd.f32 %v823_v51, %v2155_v50 }
 0x5a5   : > { %828 = vst [vmem:[%s523_s25 + $0x8] sm:$0xff] %v826_v52 }
 0x5a6   : > { %827 = vst [vmem:[%s523_s25] sm:$0xff] %v825_v53 }
 0x5a7   : > { %1620 = shalt.err (!%p1617_p13)
}
 0x5a8   : > { %s1621_s21 = scalar_lea.hbm %s2169_s22, 256  ;;  %s1625_s10 = scalar_lea.hbm %s2269_s4, 512 }
 0x5a9   : > { %p1622_p1 = scmp.ne.s32.totalorder %s2169_s22, %s1621_s21  ;;  %p1626_p2 = scmp.lt.u32.totalorder %s2169_s22, %s2269_s4 }
 0x5aa   : > { %p1627_p10 = scmp.lt.u32.totalorder %s1625_s10, %s1621_s21  ;;  %p1629_p5 = scmp.lt.u32.totalorder %s1621_s21, %s2169_s22 }
 0x5ab   : > { %p1623_p3 = pnand %p1622_p1, %p2270_p7 }
 0x5ac   : > { %p1628_p11 = por %p1627_p10, %p1626_p2 }
 0x5ad   : > { %p1624_p6 = pneg %p1623_p3 }
 0x5ae   : > { %p1630_p9 = por %p1629_p5, %p1628_p11 }
 0x5b0   : > { %p1631_p8 = pnand %p1630_p9, %p1624_p6 }
 0x5b2   : > { %1634 = shalt.err (!%p1631_p8)
}
 0x5b3   : > { %s1712_s12 = smov 128   ;;  %s1713_s17 = smov 8  }
 0x5b4   : > { %1199 = dma.vmem_to_hbm [thread:$0]  (%p2270_p7), %s2163_s3, 256, %s2169_s22, %s830_s19, %s1712_s12, %s1712_s12, %s1713_s17  }
 0x5b5 PF: > { %s858_s18 = sand.u32 1, %s1685_s13   ;;  %p2271_p12 = scmp.ne.s32.totalorder %s2252_s30, 0 }
 0x5b6   : > { %p2272_p0 = scmp.ge.s32.totalorder %s1697_s16, 2  ;;  %s859_s11 = scalar_lea.sflag [#allocation4], %s858_s18 }
 0x5b8   : > { %p1234_p4 = pnand %p2272_p0, %p2271_p12 }
 0x5ba   : > { %1680 = dma.done.wait (!%p1234_p4), %s859_s11, 256  }
 0x5bb   : > { %1682 = vsyncadd (!%p1234_p4), %s859_s11, 4294967040  ;;  %p30_p13 = scmp.ge.s32.totalorder %s1992_s23, 4   ;;  %s2273_s13 = smov %s1689_s14 }
 0x5bc   : > { %s2274_s14 = smov %s1693_s15  ;;  %s2275_s15 = smov %s2003_s28 }
 0x5bd   : > { %s2276_s16 = smov %s1992_s23  ;;  %32 = sbr.rel (!%p30_p13) target bundleno = 18 (0x12), region = 150 }
 0x5c4   :  { %864 = vsyncpa [#allocation3], 1 }
 0x5c5   :  { %866 = vsyncpa [#allocation3 + $0x1], 1 }
 0x5c6   :  { %867 = vsyncpa [#allocation6], 1 }
 0x5c7   :  { %869 = vsyncpa [#allocation6 + $0x1], 1 }
 0x5c8   :  { %870 = vsyncpa [#allocation9], 1 }
 0x5c9   :  { %871 = vsyncpa [#allocation12], 1 }
 0x5ca   :  { %872 = vsyncpa [#allocation15], 1 }
 0x5cb   :  { %873 = vsyncpa [#allocation18], 1 }
 0x5cc   :  { %874 = vsyncpa [#allocation4], 1 }
 0x5cd   :  { %876 = vsyncpa [#allocation4 + $0x1], 1 }

</bundles_post_ra>
